<compile_context>
chip_gen: v7x
topology: tpu7x:2x2x1
jax: 0.10.0
libtpu: 0.0.40
codegen_flags: <defaults>
</compile_context>

<pallas_src>
import functools

import jax
import jax.numpy as jnp
from jax import lax
from jax.experimental import pallas as pl
from jax.experimental.pallas import tpu as pltpu


def _fm_kernel(x1_ref, x2_ref, w_ref, b_ref, mask_ref, o_ref, *, C, W, L):
    """One lane-packed slab of NB images per grid step.

    x1_ref, x2_ref, o_ref : (C, L)      f32, L = NB*H*W (lane axis, dense)
    w_ref                 : (9, C, C)   f32, tap-major conv weight (dy,dx order)
    b_ref                 : (C, 1)      f32 bias
    mask_ref              : (8, C, L)   f32 border masks for the 8 off-center taps
    """
    x1 = x1_ref[...]                      # (C, L)
    x2 = x2_ref[...]
    x = x1 * x2                           # elementwise merge (VPU)

    # bias-initialized accumulator (folds the bias add into the init)
    acc = jnp.broadcast_to(b_ref[...], (C, L)).astype(jnp.float32)

    tap = 0
    midx = 0
    for dy in (-1, 0, 1):
        for dx in (-1, 0, 1):
            delta = dy * W + dx
            if delta == 0:
                shifted = x
            else:
                # shifted[c, p] = x[c, (p + delta) mod L]  (XLU lane rotation);
                # the precomputed mask zeroes every lane whose source falls
                # outside the image (incl. wraps across packed images).
                shifted = pltpu.roll(x, shift=(-delta) % L, axis=1)
                shifted = shifted * mask_ref[midx]
                midx += 1
            # tap-by-tap accumulation: (C, C) x (C, L) -> (C, L)
            acc = acc + jnp.dot(w_ref[tap], shifted,
                                preferred_element_type=jnp.float32)
            tap += 1

    # residual add; store is lane-dense (last dim = L, multiple of 128)
    o_ref[...] = (x1 + acc).astype(o_ref.dtype)


def fm_pallas(x1, x2, w, b, *, images_per_step=None):
    """FM forward.

    x1, x2 : (N, C, H, W) float32 (NCHW, PyTorch layout)
    w      : (C, C, 3, 3) float32 (PyTorch OIHW conv weight)
    b      : (C,)         float32
    returns (N, C, H, W) float32
    """
    N, C, H, W = x1.shape
    HW = H * W

    if images_per_step is None:
        # keep >= 2 grid steps when N >= 2 so both v7x TensorCores get work;
        # the extra ~0.35us step costs nothing on single-TC v5e/v6e.
        images_per_step = max(1, N // 2)
    while N % images_per_step:
        images_per_step -= 1
    NB = images_per_step
    steps = N // NB
    L = NB * HW

    # lane-packed layout: (C, N*HW), lanes ordered (image, pixel).  The (N,C)
    # transpose is a tiny one-off XLA shuffle; the spatial flatten is free.
    x1p = jnp.transpose(x1.reshape(N, C, HW), (1, 0, 2)).reshape(C, N * HW)
    x2p = jnp.transpose(x2.reshape(N, C, HW), (1, 0, 2)).reshape(C, N * HW)

    # tap-major weight (9, Cout, Cin); tap order matches the (dy, dx) loop.
    w9 = jnp.transpose(w, (2, 3, 0, 1)).reshape(9, C, C)
    b2 = b.reshape(C, 1)

    # Precompute the 8 off-center border masks once (hoisted out of the kernel),
    # replicated over Cin sublanes and tiled over the NB images in a block.
    p = jnp.arange(HW, dtype=jnp.int32)
    py, px = p // W, p % W
    rows = []
    for dy in (-1, 0, 1):
        for dx in (-1, 0, 1):
            if dy == 0 and dx == 0:
                continue
            valid = ((py + dy >= 0) & (py + dy < H) &
                     (px + dx >= 0) & (px + dx < W))
            rows.append(valid)
    mask = jnp.stack(rows).astype(jnp.float32)          # (8, HW)
    mask = jnp.tile(mask[:, None, :], (1, C, NB))       # (8, C, L)

    kernel = functools.partial(_fm_kernel, C=C, W=W, L=L)
    out = pl.pallas_call(
        kernel,
        out_shape=jax.ShapeDtypeStruct((C, N * HW), jnp.float32),
        grid_spec=pltpu.PrefetchScalarGridSpec(
            num_scalar_prefetch=0,
            grid=(steps,),
            in_specs=[
                pl.BlockSpec((C, L), lambda i: (0, i)),          # x1 slab
                pl.BlockSpec((C, L), lambda i: (0, i)),          # x2 slab
                pl.BlockSpec((9, C, C), lambda i: (0, 0, 0)),    # weights (resident)
                pl.BlockSpec((C, 1), lambda i: (0, 0)),          # bias (resident)
                pl.BlockSpec((8, C, L), lambda i: (0, 0, 0)),    # masks (resident)
            ],
            out_specs=pl.BlockSpec((C, L), lambda i: (0, i)),
        ),
        compiler_params=pltpu.CompilerParams(
            dimension_semantics=("parallel",)),
    )(x1p, x2p, w9, b2, mask)

    return out.reshape(C, N, HW).transpose(1, 0, 2).reshape(N, C, H, W)


# ---------------- pure-JAX reference (NCHW, matches PyTorch semantics) -------
def fm_ref(x1, x2, w, b):
    x = x1 * x2
    y = lax.conv_general_dilated(
        x, w, window_strides=(1, 1), padding="SAME",
        dimension_numbers=("NCHW", "OIHW", "NCHW"))
    return x1 + y + b[None, :, None, None]


if __name__ == "__main__":
    key = jax.random.PRNGKey(0)
    N, C, H, W = 2, 4, 16, 16

    k1, k2, kw, kb = jax.random.split(key, 4)
    x1 = jax.random.normal(k1, (N, C, H, W), dtype=jnp.float32)
    x2 = jax.random.normal(k2, (N, C, H, W), dtype=jnp.float32)
    w = 0.1 * jax.random.normal(kw, (C, C, 3, 3), dtype=jnp.float32)
    b = 0.1 * jax.random.normal(kb, (C,), dtype=jnp.float32)

    out = jax.block_until_ready(fm_pallas(x1, x2, w, b))
    ref = fm_ref(x1, x2, w, b)

    assert out.shape == (N, C, H, W)
    max_err = jnp.max(jnp.abs(out - ref))
    assert jnp.allclose(out, ref, atol=1e-4, rtol=1e-4), f"max err {max_err}"

    print("KERNEL_OK")
</pallas_src>

<mosaic_0001>
module attributes {stable_mosaic.version = 11 : i64} {
  func.func @_fm_kernel(%arg0: i32, %arg1: memref<4x256xf32, #tpu.memory_space<vmem>>, %arg2: memref<4x256xf32, #tpu.memory_space<vmem>>, %arg3: memref<9x4x4xf32, #tpu.memory_space<vmem>>, %arg4: memref<4x1xf32, #tpu.memory_space<vmem>>, %arg5: memref<8x4x256xf32, #tpu.memory_space<vmem>>, %arg6: memref<4x256xf32, #tpu.memory_space<vmem>>) attributes {dimension_semantics = [#tpu.dimension_semantics<parallel>], iteration_bounds = array<i64: 2>, scalar_prefetch = 0 : i64, scratch_operands = 0 : i64, tpu.core_type = #tpu.core_type<tc>, window_params = [{transform_indices = @transform_0, window_bounds = array<i64: 4, 256>}, {transform_indices = @transform_1, window_bounds = array<i64: 4, 256>}, {pipeline_mode = #tpu.pipeline_mode<synchronous>, transform_indices = @transform_2, window_bounds = array<i64: 9, 4, 4>}, {pipeline_mode = #tpu.pipeline_mode<synchronous>, transform_indices = @transform_3, window_bounds = array<i64: 4, 1>}, {pipeline_mode = #tpu.pipeline_mode<synchronous>, transform_indices = @transform_4, window_bounds = array<i64: 8, 4, 256>}, {transform_indices = @transform_5, window_bounds = array<i64: 4, 256>}]} {
    %c0 = arith.constant 0 : index
    %c0_0 = arith.constant 0 : index
    %0 = vector.load %arg1[%c0, %c0_0] : memref<4x256xf32, #tpu.memory_space<vmem>>, vector<4x256xf32>
    %c0_1 = arith.constant 0 : index
    %c0_2 = arith.constant 0 : index
    %1 = vector.load %arg2[%c0_1, %c0_2] : memref<4x256xf32, #tpu.memory_space<vmem>>, vector<4x256xf32>
    %2 = arith.mulf %0, %1 : vector<4x256xf32>
    %c0_3 = arith.constant 0 : index
    %c0_4 = arith.constant 0 : index
    %3 = vector.load %arg4[%c0_3, %c0_4] : memref<4x1xf32, #tpu.memory_space<vmem>>, vector<4x1xf32>
    %4 = vector.shape_cast %3 : vector<4x1xf32> to vector<4x1xf32>
    %5 = vector.broadcast %4 : vector<4x1xf32> to vector<4x256xf32>
    %c17_i32 = arith.constant 17 : i32
    %6 = tpu.dynamic_rotate %2 by %c17_i32 dim 1 : vector<4x256xf32>, i32 -> vector<4x256xf32>
    %c0_5 = arith.constant 0 : index
    %c0_6 = arith.constant 0 : index
    %c0_7 = arith.constant 0 : index
    %7 = vector.load %arg5[%c0_5, %c0_6, %c0_7] : memref<8x4x256xf32, #tpu.memory_space<vmem>>, vector<1x4x256xf32>
    %8 = vector.shape_cast %7 : vector<1x4x256xf32> to vector<4x256xf32>
    %9 = arith.mulf %6, %8 : vector<4x256xf32>
    %c0_8 = arith.constant 0 : index
    %c0_9 = arith.constant 0 : index
    %c0_10 = arith.constant 0 : index
    %10 = vector.load %arg3[%c0_8, %c0_9, %c0_10] : memref<9x4x4xf32, #tpu.memory_space<vmem>>, vector<1x4x4xf32>
    %11 = vector.shape_cast %10 : vector<1x4x4xf32> to vector<4x4xf32>
    %cst = arith.constant dense<0.000000e+00> : vector<4x256xf32>
    %12 = tpu.matmul %11, %9, %cst {dimension_numbers = #tpu.dot_dimension_numbers<[1], [0], [0], [1], [0, 0, 1, 1], [], []>} : vector<4x4xf32>, vector<4x256xf32>, vector<4x256xf32> -> vector<4x256xf32>
    %13 = arith.addf %5, %12 : vector<4x256xf32>
    %c16_i32 = arith.constant 16 : i32
    %14 = tpu.dynamic_rotate %2 by %c16_i32 dim 1 : vector<4x256xf32>, i32 -> vector<4x256xf32>
    %c1 = arith.constant 1 : index
    %c0_11 = arith.constant 0 : index
    %c0_12 = arith.constant 0 : index
    %15 = vector.load %arg5[%c1, %c0_11, %c0_12] : memref<8x4x256xf32, #tpu.memory_space<vmem>>, vector<1x4x256xf32>
    %16 = vector.shape_cast %15 : vector<1x4x256xf32> to vector<4x256xf32>
    %17 = arith.mulf %14, %16 : vector<4x256xf32>
    %c1_13 = arith.constant 1 : index
    %c0_14 = arith.constant 0 : index
    %c0_15 = arith.constant 0 : index
    %18 = vector.load %arg3[%c1_13, %c0_14, %c0_15] : memref<9x4x4xf32, #tpu.memory_space<vmem>>, vector<1x4x4xf32>
    %19 = vector.shape_cast %18 : vector<1x4x4xf32> to vector<4x4xf32>
    %cst_16 = arith.constant dense<0.000000e+00> : vector<4x256xf32>
    %20 = tpu.matmul %19, %17, %cst_16 {dimension_numbers = #tpu.dot_dimension_numbers<[1], [0], [0], [1], [0, 0, 1, 1], [], []>} : vector<4x4xf32>, vector<4x256xf32>, vector<4x256xf32> -> vector<4x256xf32>
    %21 = arith.addf %13, %20 : vector<4x256xf32>
    %c15_i32 = arith.constant 15 : i32
    %22 = tpu.dynamic_rotate %2 by %c15_i32 dim 1 : vector<4x256xf32>, i32 -> vector<4x256xf32>
    %c2 = arith.constant 2 : index
    %c0_17 = arith.constant 0 : index
    %c0_18 = arith.constant 0 : index
    %23 = vector.load %arg5[%c2, %c0_17, %c0_18] : memref<8x4x256xf32, #tpu.memory_space<vmem>>, vector<1x4x256xf32>
    %24 = vector.shape_cast %23 : vector<1x4x256xf32> to vector<4x256xf32>
    %25 = arith.mulf %22, %24 : vector<4x256xf32>
    %c2_19 = arith.constant 2 : index
    %c0_20 = arith.constant 0 : index
    %c0_21 = arith.constant 0 : index
    %26 = vector.load %arg3[%c2_19, %c0_20, %c0_21] : memref<9x4x4xf32, #tpu.memory_space<vmem>>, vector<1x4x4xf32>
    %27 = vector.shape_cast %26 : vector<1x4x4xf32> to vector<4x4xf32>
    %cst_22 = arith.constant dense<0.000000e+00> : vector<4x256xf32>
    %28 = tpu.matmul %27, %25, %cst_22 {dimension_numbers = #tpu.dot_dimension_numbers<[1], [0], [0], [1], [0, 0, 1, 1], [], []>} : vector<4x4xf32>, vector<4x256xf32>, vector<4x256xf32> -> vector<4x256xf32>
    %29 = arith.addf %21, %28 : vector<4x256xf32>
    %c1_i32 = arith.constant 1 : i32
    %30 = tpu.dynamic_rotate %2 by %c1_i32 dim 1 : vector<4x256xf32>, i32 -> vector<4x256xf32>
    %c3 = arith.constant 3 : index
    %c0_23 = arith.constant 0 : index
    %c0_24 = arith.constant 0 : index
    %31 = vector.load %arg5[%c3, %c0_23, %c0_24] : memref<8x4x256xf32, #tpu.memory_space<vmem>>, vector<1x4x256xf32>
    %32 = vector.shape_cast %31 : vector<1x4x256xf32> to vector<4x256xf32>
    %33 = arith.mulf %30, %32 : vector<4x256xf32>
    %c3_25 = arith.constant 3 : index
    %c0_26 = arith.constant 0 : index
    %c0_27 = arith.constant 0 : index
    %34 = vector.load %arg3[%c3_25, %c0_26, %c0_27] : memref<9x4x4xf32, #tpu.memory_space<vmem>>, vector<1x4x4xf32>
    %35 = vector.shape_cast %34 : vector<1x4x4xf32> to vector<4x4xf32>
    %cst_28 = arith.constant dense<0.000000e+00> : vector<4x256xf32>
    %36 = tpu.matmul %35, %33, %cst_28 {dimension_numbers = #tpu.dot_dimension_numbers<[1], [0], [0], [1], [0, 0, 1, 1], [], []>} : vector<4x4xf32>, vector<4x256xf32>, vector<4x256xf32> -> vector<4x256xf32>
    %37 = arith.addf %29, %36 : vector<4x256xf32>
    %c4 = arith.constant 4 : index
    %c0_29 = arith.constant 0 : index
    %c0_30 = arith.constant 0 : index
    %38 = vector.load %arg3[%c4, %c0_29, %c0_30] : memref<9x4x4xf32, #tpu.memory_space<vmem>>, vector<1x4x4xf32>
    %39 = vector.shape_cast %38 : vector<1x4x4xf32> to vector<4x4xf32>
    %cst_31 = arith.constant dense<0.000000e+00> : vector<4x256xf32>
    %40 = tpu.matmul %39, %2, %cst_31 {dimension_numbers = #tpu.dot_dimension_numbers<[1], [0], [0], [1], [0, 0, 1, 1], [], []>} : vector<4x4xf32>, vector<4x256xf32>, vector<4x256xf32> -> vector<4x256xf32>
    %41 = arith.addf %37, %40 : vector<4x256xf32>
    %c255_i32 = arith.constant 255 : i32
    %42 = tpu.dynamic_rotate %2 by %c255_i32 dim 1 : vector<4x256xf32>, i32 -> vector<4x256xf32>
    %c4_32 = arith.constant 4 : index
    %c0_33 = arith.constant 0 : index
    %c0_34 = arith.constant 0 : index
    %43 = vector.load %arg5[%c4_32, %c0_33, %c0_34] : memref<8x4x256xf32, #tpu.memory_space<vmem>>, vector<1x4x256xf32>
    %44 = vector.shape_cast %43 : vector<1x4x256xf32> to vector<4x256xf32>
    %45 = arith.mulf %42, %44 : vector<4x256xf32>
    %c5 = arith.constant 5 : index
    %c0_35 = arith.constant 0 : index
    %c0_36 = arith.constant 0 : index
    %46 = vector.load %arg3[%c5, %c0_35, %c0_36] : memref<9x4x4xf32, #tpu.memory_space<vmem>>, vector<1x4x4xf32>
    %47 = vector.shape_cast %46 : vector<1x4x4xf32> to vector<4x4xf32>
    %cst_37 = arith.constant dense<0.000000e+00> : vector<4x256xf32>
    %48 = tpu.matmul %47, %45, %cst_37 {dimension_numbers = #tpu.dot_dimension_numbers<[1], [0], [0], [1], [0, 0, 1, 1], [], []>} : vector<4x4xf32>, vector<4x256xf32>, vector<4x256xf32> -> vector<4x256xf32>
    %49 = arith.addf %41, %48 : vector<4x256xf32>
    %c241_i32 = arith.constant 241 : i32
    %50 = tpu.dynamic_rotate %2 by %c241_i32 dim 1 : vector<4x256xf32>, i32 -> vector<4x256xf32>
    %c5_38 = arith.constant 5 : index
    %c0_39 = arith.constant 0 : index
    %c0_40 = arith.constant 0 : index
    %51 = vector.load %arg5[%c5_38, %c0_39, %c0_40] : memref<8x4x256xf32, #tpu.memory_space<vmem>>, vector<1x4x256xf32>
    %52 = vector.shape_cast %51 : vector<1x4x256xf32> to vector<4x256xf32>
    %53 = arith.mulf %50, %52 : vector<4x256xf32>
    %c6 = arith.constant 6 : index
    %c0_41 = arith.constant 0 : index
    %c0_42 = arith.constant 0 : index
    %54 = vector.load %arg3[%c6, %c0_41, %c0_42] : memref<9x4x4xf32, #tpu.memory_space<vmem>>, vector<1x4x4xf32>
    %55 = vector.shape_cast %54 : vector<1x4x4xf32> to vector<4x4xf32>
    %cst_43 = arith.constant dense<0.000000e+00> : vector<4x256xf32>
    %56 = tpu.matmul %55, %53, %cst_43 {dimension_numbers = #tpu.dot_dimension_numbers<[1], [0], [0], [1], [0, 0, 1, 1], [], []>} : vector<4x4xf32>, vector<4x256xf32>, vector<4x256xf32> -> vector<4x256xf32>
    %57 = arith.addf %49, %56 : vector<4x256xf32>
    %c240_i32 = arith.constant 240 : i32
    %58 = tpu.dynamic_rotate %2 by %c240_i32 dim 1 : vector<4x256xf32>, i32 -> vector<4x256xf32>
    %c6_44 = arith.constant 6 : index
    %c0_45 = arith.constant 0 : index
    %c0_46 = arith.constant 0 : index
    %59 = vector.load %arg5[%c6_44, %c0_45, %c0_46] : memref<8x4x256xf32, #tpu.memory_space<vmem>>, vector<1x4x256xf32>
    %60 = vector.shape_cast %59 : vector<1x4x256xf32> to vector<4x256xf32>
    %61 = arith.mulf %58, %60 : vector<4x256xf32>
    %c7 = arith.constant 7 : index
    %c0_47 = arith.constant 0 : index
    %c0_48 = arith.constant 0 : index
    %62 = vector.load %arg3[%c7, %c0_47, %c0_48] : memref<9x4x4xf32, #tpu.memory_space<vmem>>, vector<1x4x4xf32>
    %63 = vector.shape_cast %62 : vector<1x4x4xf32> to vector<4x4xf32>
    %cst_49 = arith.constant dense<0.000000e+00> : vector<4x256xf32>
    %64 = tpu.matmul %63, %61, %cst_49 {dimension_numbers = #tpu.dot_dimension_numbers<[1], [0], [0], [1], [0, 0, 1, 1], [], []>} : vector<4x4xf32>, vector<4x256xf32>, vector<4x256xf32> -> vector<4x256xf32>
    %65 = arith.addf %57, %64 : vector<4x256xf32>
    %c239_i32 = arith.constant 239 : i32
    %66 = tpu.dynamic_rotate %2 by %c239_i32 dim 1 : vector<4x256xf32>, i32 -> vector<4x256xf32>
    %c7_50 = arith.constant 7 : index
    %c0_51 = arith.constant 0 : index
    %c0_52 = arith.constant 0 : index
    %67 = vector.load %arg5[%c7_50, %c0_51, %c0_52] : memref<8x4x256xf32, #tpu.memory_space<vmem>>, vector<1x4x256xf32>
    %68 = vector.shape_cast %67 : vector<1x4x256xf32> to vector<4x256xf32>
    %69 = arith.mulf %66, %68 : vector<4x256xf32>
    %c8 = arith.constant 8 : index
    %c0_53 = arith.constant 0 : index
    %c0_54 = arith.constant 0 : index
    %70 = vector.load %arg3[%c8, %c0_53, %c0_54] : memref<9x4x4xf32, #tpu.memory_space<vmem>>, vector<1x4x4xf32>
    %71 = vector.shape_cast %70 : vector<1x4x4xf32> to vector<4x4xf32>
    %cst_55 = arith.constant dense<0.000000e+00> : vector<4x256xf32>
    %72 = tpu.matmul %71, %69, %cst_55 {dimension_numbers = #tpu.dot_dimension_numbers<[1], [0], [0], [1], [0, 0, 1, 1], [], []>} : vector<4x4xf32>, vector<4x256xf32>, vector<4x256xf32> -> vector<4x256xf32>
    %73 = arith.addf %65, %72 : vector<4x256xf32>
    %74 = arith.addf %0, %73 : vector<4x256xf32>
    %c0_56 = arith.constant 0 : index
    %c0_57 = arith.constant 0 : index
    %75 = vector.load %arg6[%c0_56, %c0_57] : memref<4x256xf32, #tpu.memory_space<vmem>>, vector<4x256xf32>
    tpu.vector_store %arg6[%c0_56, %c0_57], %74 {strides = array<i32>} : memref<4x256xf32, #tpu.memory_space<vmem>>, vector<4x256xf32>,
    return
  }
  func.func @transform_0(%arg0: i32) -> (i32, i32) {
    %c0_i32 = arith.constant 0 : i32
    %c0_i32_0 = arith.constant 0 : i32
    return %c0_i32, %arg0 : i32, i32
  }
  func.func @transform_1(%arg0: i32) -> (i32, i32) {
    %c0_i32 = arith.constant 0 : i32
    %c0_i32_0 = arith.constant 0 : i32
    return %c0_i32, %arg0 : i32, i32
  }
  func.func @transform_2(%arg0: i32) -> (i32, i32, i32) {
    %c0_i32 = arith.constant 0 : i32
    %c0_i32_0 = arith.constant 0 : i32
    %c0_i32_1 = arith.constant 0 : i32
    %c0_i32_2 = arith.constant 0 : i32
    return %c0_i32, %c0_i32_0, %c0_i32_1 : i32, i32, i32
  }
  func.func @transform_3(%arg0: i32) -> (i32, i32) {
    %c0_i32 = arith.constant 0 : i32
    %c0_i32_0 = arith.constant 0 : i32
    %c0_i32_1 = arith.constant 0 : i32
    return %c0_i32, %c0_i32_0 : i32, i32
  }
  func.func @transform_4(%arg0: i32) -> (i32, i32, i32) {
    %c0_i32 = arith.constant 0 : i32
    %c0_i32_0 = arith.constant 0 : i32
    %c0_i32_1 = arith.constant 0 : i32
    %c0_i32_2 = arith.constant 0 : i32
    return %c0_i32, %c0_i32_0, %c0_i32_1 : i32, i32, i32
  }
  func.func @transform_5(%arg0: i32) -> (i32, i32) {
    %c0_i32 = arith.constant 0 : i32
    %c0_i32_0 = arith.constant 0 : i32
    return %c0_i32, %arg0 : i32, i32
  }
}

</mosaic_0001>

<bundles_post_ra>
// kernel: tpu_custom_call.1
= control target key start
LH: loop header
LB: loop body
LE: loop exit
PB: predicated region body
PF: predicated region fallthrough
CT: control target
= control target key end

     0   :  { %10 = vsyncpa [#allocation3], 0  ;;  %s1924_s0 = inlined_call_operand.hbm [shape: f32[4,512], index: 0, kind: input, shape index: {}]   ;;  %s1925_s1 = inlined_call_operand.hbm [shape: f32[4,512], index: 1, kind: input, shape index: {}]   ;;  %s1926_s2 = inlined_call_operand.vmem [shape: f32[9,4,4], index: 2, kind: input, shape index: {}]   ;;  %s1927_s3 = inlined_call_operand.vmem [shape: f32[4,1], index: 3, kind: input, shape index: {}]   ;;  %s1928_s4 = inlined_call_operand.vmem [shape: f32[8,4,256], index: 4, kind: input, shape index: {}]   ;;  %s1929_s5 = inlined_call_operand.hbm [shape: f32[4,512], index: 5, kind: output, shape index: {}]  }
   0x1   :  { %12 = vsyncpa [#allocation3 + $0x1], 0 }
   0x2   :  { %13 = vsyncpa [#allocation6], 0 }
   0x3   :  { %15 = vsyncpa [#allocation6 + $0x1], 0 }
   0x4   :  { %16 = vsyncpa [#allocation4], 0 }
   0x5   :  { %18 = vsyncpa [#allocation4 + $0x1], 0  ;;  %s1602_s18 = smov 0   ;;  %s1604_s19 = smov 0  }
   0x6   :  { %s1606_s20 = smov 0   ;;  %s1608_s21 = smov 0  }
   0x7 LB: > { %s1623_s22 = sadd.s32 4294967295, %s1557_s21   ;;  %s1276_s23 = sadd.s32 4294967294, %s1557_s21   ;;  %s1557_s21 = sphi %s1608_s21, %s1948_s21   ;;  %s1553_s20 = sphi %s1606_s20, %s1947_s20   ;;  %s1549_s19 = sphi %s1604_s19, %s1946_s19   ;;  %s1545_s18 = sphi %s1602_s18, %s1945_s18  }
   0x8   : > { %s1627_s24 = sadd.s32 1, %s1557_s21   ;;  %s31_s25 = sadd.s32 1, %s1553_s20 }
   0x9   : > { %s28_s26 = ssub.s32 %s1557_s21, %s1627_s24  ;;  %p38_p0 = scmp.ne.s32.totalorder %s1553_s20, %s1549_s19 }
   0xa   : > { %p29_p1 = scmp.eq.s32.totalorder %s28_s26, 0  ;;  %p39_p2 = scmp.eq.s32.totalorder %s1557_s21, 0 }
   0xb   : > { %p44_p3 = scmp.ne.s32.totalorder %s1549_s19, %s1545_s18  ;;  %p45_p4 = scmp.eq.s32.totalorder %s1623_s22, 0 }
   0xc   : > { %s1639_s27 = scalar_select %p29_p1, %s1553_s20, %s31_s25  }
   0xd   : > { %p1641_p5 = por %p39_p2, %p38_p0  ;;  %p1645_p6 = por %p45_p4, %p44_p3 }
   0xe   : > { %p157_p7 = scmp.eq.s32.totalorder %s1623_s22, 1  ;;  %p163_p8 = scmp.eq.s32.totalorder %s1276_s23, 1 }
   0xf   : > { %s1933_s29 = scalar_select %p1645_p6, 1, 0 }
  0x10   : > { %p1374_p10 = scmp.lt.s32.totalorder %s1557_s21, 2  ;;  %p1652_p11 = por %p157_p7, %p38_p0 }
  0x11   : > { %p1656_p12 = por %p163_p8, %p44_p3  ;;  %s1661_s7 = sand.u32 1, %s1553_s20  }
  0x12   : > { %s1934_s30 = scalar_select %p1652_p11, 1, 0 }
  0x13   : > { %s1935_s6 = scalar_select %p1656_p12, 1, 0 }
  0x14   : > { %s1336_s8 = sshll.u32 %s1557_s21, 7  ;;  %s1279_s9 = sshll.u32 %s1661_s7, 3 }
  0x15   : > { %s1670_s12 = scalar_lea.hbm %s1924_s0, %s1336_s8  ;;  %s196_s13 = scalar_lea.vmem [#allocation2], %s1279_s9 }
  0x16   : > { %s204_s14 = sshll.u32 %s196_s13, 4  ;;  %p1676_p13 = pnand %p1374_p10, %p1641_p5  ;;  %s1680_s14 = int_to_ptr.vmem [resolvable:$true] %s204_s14 }
  0x17   : > { %s193_s16 = scalar_lea.sflag [#allocation3], %s1661_s7  ;;  %s1427_s17 = scalar_lea.hbm %s1670_s12, 128 }
  0x18   : > { %p1428_p2 = scmp.ne.s32.totalorder %s1670_s12, %s1427_s17  ;;  %p1429_p3 = pneg %p1676_p13 }
  0x19   : > { %s1432_s26 = scalar_lea.hbm %s1924_s0, 256  ;;  %p1433_p5 = scmp.lt.u32.totalorder %s1670_s12, %s1924_s0 }
  0x1a   : > { %p1430_p4 = pnand %p1429_p3, %p1428_p2  ;;  %p1434_p8 = scmp.lt.u32.totalorder %s1432_s26, %s1427_s17 }
  0x1b   : > { %p1436_p9 = scmp.lt.u32.totalorder %s1427_s17, %s1670_s12 }
  0x1c   : > { %p1431_p7 = pneg %p1430_p4  ;;  %p1435_p10 = por %p1434_p8, %p1433_p5 }
  0x1e   : > { %p1437_p0 = por %p1436_p9, %p1435_p10 }
  0x20   : > { %p1438_p1 = pnand %p1437_p0, %p1431_p7 }
  0x22   : > { %1441 = shalt.err (!%p1438_p1)
}
  0x23   : > { %s1442_s11 = scalar_lea.vmem %s1680_s14, 128  ;;  %s1559_s13 = smov [#allocation2]  }
  0x24   : > { %p1443_p2 = scmp.ne.s32.totalorder %s1680_s14, %s1442_s11  ;;  %s1447_s23 = sshll.u32 %s1559_s13, 4  ;;  %s1448_s23 = int_to_ptr.vmem [resolvable:$false] %s1447_s23 }
  0x25   : > { %s1449_s25 = scalar_lea.vmem %s1448_s23, 256  ;;  %p1450_p11 = scmp.lt.s32.totalorder %s1680_s14, %s1448_s23 }
  0x26   : > { %p1445_p4 = pnand %p1443_p2, %p1429_p3  ;;  %p1451_p5 = scmp.lt.s32.totalorder %s1449_s25, %s1442_s11 }
  0x28   : > { %p1446_p12 = pneg %p1445_p4  ;;  %p1452_p8 = por %p1451_p5, %p1450_p11 }
  0x2a   : > { %p1453_p9 = pnand %p1452_p8, %p1446_p12 }
  0x2c   : > { %1456 = shalt.err (!%p1453_p9)
}
  0x2d   : > { %1366 = dma.hbm_to_vmem [thread:$0]  (!%p1676_p13), %s1670_s12, 128, %s1680_s14, %s193_s16  }
  0x2e   : > { %p1937_p0 = scmp.lt.s32.totalorder %s1557_s21, 3  ;;  %p1938_p1 = scmp.ge.s32.totalorder %s1557_s21, 1 }
  0x2f   : > { %s1723_s10 = scalar_lea.hbm %s1925_s1, %s1336_s8  ;;  %s215_s11 = scalar_lea.vmem [#allocation5], %s1279_s9 }
  0x30   : > { %p1714_p7 = pnand %p1938_p1, %p1937_p0  ;;  %s223_s13 = sshll.u32 %s215_s11, 4  ;;  %s224_s13 = int_to_ptr.vmem [resolvable:$true] %s223_s13 }
  0x31   : > { %s212_s12 = scalar_lea.sflag [#allocation6], %s1661_s7  ;;  %s1457_s14 = scalar_lea.hbm %s1723_s10, 128 }
  0x32   : > { %s1939_s17 = scalar_select %p1714_p7, 1, 0 }
  0x33   : > { %p1458_p11 = scmp.ne.s32.totalorder %s1723_s10, %s1457_s14  ;;  %s1462_s8 = scalar_lea.hbm %s1925_s1, 256 }
  0x34   : > { %p1463_p2 = scmp.lt.u32.totalorder %s1723_s10, %s1925_s1  ;;  %p1464_p4 = scmp.lt.u32.totalorder %s1462_s8, %s1457_s14 }
  0x35   : > { %p1460_p12 = pnand %p1458_p11, %p1429_p3  ;;  %p1466_p8 = scmp.lt.u32.totalorder %s1457_s14, %s1723_s10 }
  0x36   : > { %p1465_p5 = por %p1464_p4, %p1463_p2 }
  0x37   : > { %p1461_p10 = pneg %p1460_p12 }
  0x38   : > { %p1467_p9 = por %p1466_p8, %p1465_p5 }
  0x3a   : > { %p1468_p0 = pnand %p1467_p9, %p1461_p10 }
  0x3c   : > { %1471 = shalt.err (!%p1468_p0)
}
  0x3d   : > { %s1472_s7 = scalar_lea.vmem %s224_s13, 128  ;;  %s1560_s9 = smov [#allocation5]  }
  0x3e   : > { %p1473_p1 = scmp.ne.s32.totalorder %s224_s13, %s1472_s7  ;;  %s1477_s28 = sshll.u32 %s1560_s9, 4  ;;  %s1478_s28 = int_to_ptr.vmem [resolvable:$false] %s1477_s28 }
  0x3f   : > { %s1479_s11 = scalar_lea.vmem %s1478_s28, 256  ;;  %p1480_p6 = scmp.lt.s32.totalorder %s224_s13, %s1478_s28 }
  0x40   : > { %p1475_p11 = pnand %p1473_p1, %p1429_p3  ;;  %p1481_p7 = scmp.lt.s32.totalorder %s1479_s11, %s1472_s7 }
  0x42   : > { %p1476_p12 = pneg %p1475_p11  ;;  %p1482_p2 = por %p1481_p7, %p1480_p6 }
  0x44   : > { %p1483_p4 = pnand %p1482_p2, %p1476_p12 }
  0x46   : > { %1486 = shalt.err (!%p1483_p4)
}
  0x47   : > { %1369 = dma.hbm_to_vmem [thread:$0]  (!%p1676_p13), %s1723_s10, 128, %s224_s13, %s212_s12  }
  0x48   : > { %p1940_p10 = scmp.ne.s32.totalorder %s1939_s17, 0 }
  0x49   : > { %s1750_s14 = sand.u32 (!%p1940_p10), 1, %s1549_s19   ;;  %p1941_p6 = scmp.ne.s32.totalorder (!%p1940_p10), %s1933_s29, 0 }
  0x4a   : > { %232 = sbr.rel (%p1940_p10) target bundleno = 470 (0x1d6), region = 40  ;;  %s1753_s16 = sshll.u32 (!%p1940_p10), %s1750_s14, 3 }
  0x4b   : > { %s235_s23 = scalar_lea.sflag (!%p1940_p10), [#allocation3], %s1750_s14  ;;  %s238_s8 = scalar_lea.vmem (!%p1940_p10), [#allocation2], %s1753_s16 }
  0x51   : > { %1532 = dma.done.wait (%p1941_p6), %s235_s23, 128  }
  0x52   : > { %1534 = vsyncadd (%p1941_p6), %s235_s23, 4294967168  ;;  %s244_s15 = scalar_lea.sflag [#allocation6], %s1750_s14  ;;  %s247_s17 = scalar_lea.vmem [#allocation5], %s1753_s16 }
  0x53   : > { %1536 = dma.done.wait (%p1941_p6), %s244_s15, 128  }
  0x54   : > { %1538 = vsyncadd (%p1941_p6), %s244_s15, 4294967168  ;;  %v1561_v0 = vmov 0.0   ;;  %v1769_v1 = vld [vmem:[%s238_s8] sm:$0xff]  ;;  %v283_v2 = vld [vmem:[%s247_s17] sm:$0xff]  ;;  %vm314_vm0 = vcmask 1043456   ;;  %s1562_s10 = smov 127   ;;  %v298_v8 = vlaneseq }
  0x55   : > { %761 = vmatprep.mubr.f32.mxu0 %v1561_v0  ;;  %385 = vmatprep.mubr.f32.mxu1 %v1561_v0  ;;  %v284_v3 = vmul.f32 %v283_v2, %v1769_v1  ;;  %s1563_s13 = smov 17   ;;  %vm310_vm1 = vcmask 31744   ;;  %v1307_v5 = vld [vmem:[%s1926_s2 + $0x10] sm:$0xf]  ;;  %s1564_s25 = smov 16   ;;  %v1568_v6 = vmov 0  }
  0x56   : > { %s1565_s26 = smov 113   ;;  %s1566_s7 = smov 15   ;;  %1418 = vset.pattern.permute.xlu0 %v1568_v6  ;;  %v285_v7 = vld [vmem:[%s1927_s3] sm:$0xf]  ;;  %v1782_v9 = vand.u32 127, %v298_v8  ;;  %v1292_v14 = vld [vmem:[%s1928_s4 + $0x8] sm:$0xff] }
  0x57   : > { %770 = vrot.lane.b32.xlu1 %v284_v3, %s1562_s10  ;;  %294 = vrot.lane.b32.xlu0 %v284_v3, %s1563_s13  ;;  %v292_v4 = vcombine.high %v284_v3, %v284_v3  ;;  %s1567_s9 = smov 112   ;;  %s1569_s28 = smov 1   ;;  %v1311_v10 = vld [vmem:[%s1928_s4 + $0x20] sm:$0xff]  ;;  %v404_v19 = vcombine.high %v1292_v14, %v1292_v14  ;;  %v1312_v29 = vld [vmem:[%s1926_s2 + $0x14] sm:$0xf] }
  0x58   : > { %s1570_s11 = smov 111   ;;  %v303_v11 = vld [vmem:[%s1928_s4] sm:$0xff]  ;;  %vm774_vm2 = vcmp.lt.s32.totalorder %v1782_v9, 127  ;;  %v780_v15 = vcombine.high %v1311_v10, %v1311_v10  ;;  %vm300_vm3 = vcmp.lt.s32.totalorder %v1782_v9, 17  ;;  %vm398_vm4 = vcmp.lt.s32.totalorder %v1782_v9, 16  ;;  %v1316_v30 = vld [vmem:[%s1928_s4 + $0x28] sm:$0xff] }
  0x59   : > { %1308 = vmatprep.subr.msk.mxu0 %vm314_vm0, %v292_v4  ;;  %v305_v16 = vcombine.high %v303_v11, %v303_v11  ;;  %v309_v28 = vld [vmem:[%s1926_s2] sm:$0xf]  ;;  %vm872_vm5 = vcmp.lt.s32.totalorder %v1782_v9, 113  ;;  %v878_v37 = vcombine.high %v1316_v30, %v1316_v30  ;;  %v1297_v38 = vld [vmem:[%s1928_s4 + $0x10] sm:$0xff]  ;;  %vm496_vm6 = vcmp.lt.s32.totalorder %v1782_v9, 15  ;;  %v1302_v56 = vld [vmem:[%s1928_s4 + $0x18] sm:$0xff] }
  0x5a   : > { %1309 = vmatpush1.msk.msra.mxu0 %vm314_vm0, %v284_v3  ;;  %v502_v45 = vcombine.high %v1297_v38, %v1297_v38  ;;  %v1293_v46 = vld [vmem:[%s1926_s2 + $0x4] sm:$0xf]  ;;  %v1317_v47 = vld [vmem:[%s1926_s2 + $0x18] sm:$0xf]  ;;  %v1321_v48 = vld [vmem:[%s1928_s4 + $0x30] sm:$0xff]  ;;  %vm970_vm7 = vcmp.lt.s32.totalorder %v1782_v9, 112  ;;  %v600_v63 = vcombine.high %v1302_v56, %v1302_v56 }
  0x5b   : > { %772 = vrot.lane.b32.xlu1 %v292_v4, %s1562_s10  ;;  %296 = vrot.lane.b32.xlu0 %v292_v4, %s1563_s13  ;;  %v976_v55 = vcombine.high %v1321_v48, %v1321_v48  ;;  %vm594_vm8 = vcmp.lt.s32.totalorder %v1782_v9, 1  ;;  %v1298_v2 = vld [vmem:[%s1926_s2 + $0x8] sm:$0xf]  ;;  %vm1068_vm9 = vcmp.lt.s32.totalorder %v1782_v9, 111  ;;  %v1303_v9 = vld [vmem:[%s1926_s2 + $0xc] sm:$0xf] }
  0x5c   : > { %1310 = vmatmul.mubr.msk.f32.vlgmr.msra.gmra.mrb[0].mxu0 %vm310_vm1, %v1307_v5  ;;  %s1338_s29 = sshll.u32 %s1623_s22, 7  ;;  %s278_s12 = scalar_lea.vmem [#allocation7], %s1753_s16 }
  0x5d   : > { %859 = vmatprep.mubr.f32.mxu0 %v1561_v0  ;;  %p1942_p3 = scmp.ne.s32.totalorder %s1934_s30, 0  ;;  %s1571_s22 = smov [#allocation7]  }
  0x5e   : > { %s1491_s16 = sshll.u32 %s1571_s22, 4  ;;  %s1492_s16 = int_to_ptr.vmem [resolvable:$false] %s1491_s16 }
  0x5f   : > { %396 = vrot.lane.b32.xlu1 %v292_v4, %s1564_s25  ;;  %394 = vrot.lane.b32.xlu0 %v284_v3, %s1564_s25  ;;  %s1183_s25 = sshll.u32 %s278_s12, 4  ;;  %s1493_s23 = scalar_lea.vmem %s1492_s16, 256  ;;  %s1882_s25 = int_to_ptr.vmem [resolvable:$true] %s1183_s25 }
  0x60   : > { %p1494_p8 = scmp.lt.s32.totalorder %s1882_s25, %s1492_s16 }
  0x63   : > { %870 = vrot.lane.b32.xlu1 %v292_v4, %s1565_s26  ;;  %868 = vrot.lane.b32.xlu0 %v284_v3, %s1565_s26 }
  0x67   : > { %494 = vrot.lane.b32.xlu1 %v292_v4, %s1566_s7  ;;  %492 = vrot.lane.b32.xlu0 %v284_v3, %s1566_s7 }
  0x6b   : > { %968 = vrot.lane.b32.xlu1 %v292_v4, %s1567_s9  ;;  %966 = vrot.lane.b32.xlu0 %v284_v3, %s1567_s9  ;;  %s1880_s9 = scalar_lea.hbm %s1929_s5, %s1338_s29 }
  0x6f   : > { %592 = vrot.lane.b32.xlu1 %v292_v4, %s1569_s28  ;;  %590 = vrot.lane.b32.xlu0 %v284_v3, %s1569_s28  ;;  %s1169_s28 = scalar_lea.sflag [#allocation4], %s1750_s14 }
  0x73   : > { %1066 = vrot.lane.b32.xlu1 %v292_v4, %s1570_s11  ;;  %1064 = vrot.lane.b32.xlu0 %v284_v3, %s1570_s11  ;;  %v1322_v3 = vld [vmem:[%s1926_s2 + $0x1c] sm:$0xf]  ;;  %s1487_s11 = scalar_lea.vmem %s1882_s25, 128 }
  0x74   : > { %v1326_v4 = vld [vmem:[%s1928_s4 + $0x38] sm:$0xff]  ;;  %p1488_p13 = scmp.ne.s32.totalorder %s1882_s25, %s1487_s11  ;;  %p1495_p9 = scmp.lt.s32.totalorder %s1493_s23, %s1487_s11 }
  0x76   : > { %p1489_p7 = pnand %p1488_p13, %p1942_p3  ;;  %p1496_p0 = por %p1495_p9, %p1494_p8 }
  0x77   : > { %288 = vperm.xlu0 %1418, %v285_v7  }
  0x78   : > { %p1490_p5 = pneg %p1489_p7 }
  0x7a   : > { %p1497_p1 = pnand %p1496_p0, %p1490_p5 }
  0xc9   : > { %v771_v12 = vpop.permute.xlu1 %770  ;;  %v295_v13 = vpop.permute.xlu0 %294 }
  0xcd   : > { %v773_v17 = vpop.permute.xlu1 %772  ;;  %v297_v18 = vpop.permute.xlu0 %296 }
  0xce   : > { %v775_v20 = vsel %vm774_vm2, %v771_v12, %v773_v17  ;;  %v776_v21 = vsel %vm774_vm2, %v773_v17, %v771_v12  ;;  %v301_v22 = vsel %vm300_vm3, %v295_v13, %v297_v18  ;;  %v302_v23 = vsel %vm300_vm3, %v297_v18, %v295_v13 }
  0xcf   : > { %v782_v24 = vmul.f32 %v1311_v10, %v775_v20  ;;  %v783_v25 = vmul.f32 %v780_v15, %v776_v21  ;;  %v307_v26 = vmul.f32 %v303_v11, %v302_v23  ;;  %v308_v27 = vmul.f32 %v305_v16, %v301_v22 }
  0xd0   : > { %v1074_v12 = vcombine.high %v1326_v4, %v1326_v4 }
  0xd1   : > { %v397_v31 = vpop.permute.xlu1 %396  ;;  %1289 = vmatprep.subr.msk.mxu1 %vm314_vm0, %v308_v27  ;;  %v395_v32 = vpop.permute.xlu0 %394  ;;  %1313 = vmatprep.subr.msk.mxu0 %vm314_vm0, %v783_v25 }
  0xd2   : > { %v399_v33 = vsel %vm398_vm4, %v395_v32, %v397_v31  ;;  %v400_v34 = vsel %vm398_vm4, %v397_v31, %v395_v32  ;;  %1290 = vmatpush1.msk.msra.mxu1 %vm314_vm0, %v307_v26  ;;  %1314 = vmatpush1.msk.msra.mxu0 %vm314_vm0, %v782_v24 }
  0xd3   : > { %v406_v35 = vmul.f32 %v1292_v14, %v400_v34  ;;  %v407_v36 = vmul.f32 %v404_v19, %v399_v33  ;;  %1291 = vmatmul.mubr.msk.f32.vlgmr.msra.gmra.mrb[0].mxu1 %vm310_vm1, %v309_v28  ;;  %1315 = vmatmul.mubr.msk.f32.vlgmr.msra.gmra.mrb[0].mxu0 %vm310_vm1, %v1312_v29 }
  0xd4   : > { %483 = vmatprep.mubr.f32.mxu1 %v1561_v0  ;;  %957 = vmatprep.mubr.f32.mxu0 %v1561_v0 }
  0xd5   : > { %v871_v39 = vpop.permute.xlu1 %870  ;;  %1294 = vmatprep.subr.msk.mxu1 %vm314_vm0, %v407_v36  ;;  %v869_v40 = vpop.permute.xlu0 %868 }
  0xd6   : > { %v873_v41 = vsel %vm872_vm5, %v869_v40, %v871_v39  ;;  %v874_v42 = vsel %vm872_vm5, %v871_v39, %v869_v40  ;;  %1295 = vmatpush1.msk.msra.mxu1 %vm314_vm0, %v406_v35 }
  0xd7   : > { %v880_v43 = vmul.f32 %v1316_v30, %v873_v41  ;;  %v881_v44 = vmul.f32 %v878_v37, %v874_v42 }
  0xd9   : > { %v495_v49 = vpop.permute.xlu1 %494  ;;  %v493_v50 = vpop.permute.xlu0 %492  ;;  %1318 = vmatprep.subr.msk.mxu0 %vm314_vm0, %v881_v44 }
  0xda   : > { %v497_v51 = vsel %vm496_vm6, %v493_v50, %v495_v49  ;;  %v498_v52 = vsel %vm496_vm6, %v495_v49, %v493_v50  ;;  %1319 = vmatpush1.msk.msra.mxu0 %vm314_vm0, %v880_v43 }
  0xdb   : > { %v504_v53 = vmul.f32 %v1297_v38, %v498_v52  ;;  %v505_v54 = vmul.f32 %v502_v45, %v497_v51  ;;  %1296 = vmatmul.mubr.msk.f32.vlgmr.msra.gmra.mrb[0].mxu1 %vm310_vm1, %v1293_v46  ;;  %1320 = vmatmul.mubr.msk.f32.vlgmr.msra.gmra.mrb[0].mxu0 %vm310_vm1, %v1317_v47 }
  0xdc   : > { %581 = vmatprep.mubr.f32.mxu1 %v1561_v0  ;;  %1055 = vmatprep.mubr.f32.mxu0 %v1561_v0 }
  0xdd   : > { %v969_v57 = vpop.permute.xlu1 %968  ;;  %1299 = vmatprep.subr.msk.mxu1 %vm314_vm0, %v505_v54  ;;  %v967_v58 = vpop.permute.xlu0 %966 }
  0xde   : > { %v971_v59 = vsel %vm970_vm7, %v967_v58, %v969_v57  ;;  %v972_v60 = vsel %vm970_vm7, %v969_v57, %v967_v58  ;;  %1300 = vmatpush1.msk.msra.mxu1 %vm314_vm0, %v504_v53 }
  0xdf   : > { %v978_v61 = vmul.f32 %v1321_v48, %v971_v59  ;;  %v979_v62 = vmul.f32 %v976_v55, %v972_v60 }
  0xe1   : > { %v593_v5 = vpop.permute.xlu1 %592  ;;  %v591_v6 = vpop.permute.xlu0 %590  ;;  %1323 = vmatprep.subr.msk.mxu0 %vm314_vm0, %v979_v62 }
  0xe2   : > { %v595_v7 = vsel %vm594_vm8, %v591_v6, %v593_v5  ;;  %v596_v8 = vsel %vm594_vm8, %v593_v5, %v591_v6  ;;  %1324 = vmatpush1.msk.msra.mxu0 %vm314_vm0, %v978_v61 }
  0xe3   : > { %v602_v10 = vmul.f32 %v1302_v56, %v596_v8  ;;  %v603_v11 = vmul.f32 %v600_v63, %v595_v7  ;;  %1301 = vmatmul.mubr.msk.f32.vlgmr.msra.gmra.mrb[0].mxu1 %vm310_vm1, %v1298_v2  ;;  %1325 = vmatmul.mubr.msk.f32.vlgmr.msra.gmra.mrb[0].mxu0 %vm310_vm1, %v1322_v3 }
  0xe4   : > { %679 = vmatprep.mubr.f32.mxu1 %v1561_v0  ;;  %1153 = vmatprep.mubr.f32.mxu0 %v1561_v0  ;;  %v1327_v0 = vld [vmem:[%s1926_s2 + $0x20] sm:$0xf] }
  0xe5   : > { %v1067_v13 = vpop.permute.xlu1 %1066  ;;  %1304 = vmatprep.subr.msk.mxu1 %vm314_vm0, %v603_v11  ;;  %v1065_v14 = vpop.permute.xlu0 %1064 }
  0xe6   : > { %v1069_v15 = vsel %vm1068_vm9, %v1065_v14, %v1067_v13  ;;  %v1070_v16 = vsel %vm1068_vm9, %v1067_v13, %v1065_v14  ;;  %1305 = vmatpush1.msk.msra.mxu1 %vm314_vm0, %v602_v10 }
  0xe7   : > { %v1076_v17 = vmul.f32 %v1326_v4, %v1069_v15  ;;  %v1077_v18 = vmul.f32 %v1074_v12, %v1070_v16 }
  0xe9   : > { %1328 = vmatprep.subr.msk.mxu0 %vm314_vm0, %v1077_v18 }
  0xea   : > { %1329 = vmatpush1.msk.msra.mxu0 %vm314_vm0, %v1076_v17 }
  0xeb   : > { %1306 = vmatmul.mubr.msk.f32.vlgmr.msra.gmra.mrb[0].mxu1 %vm310_vm1, %v1303_v9  ;;  %1330 = vmatmul.mubr.msk.f32.vlgmr.msra.gmra.mrb[0].mxu0 %vm310_vm1, %v1327_v0 }
  0xf6   : > { %v289_v19 = vpop.permute.xlu0 %288 }
 0x1be   : > { %v681_v20 = vpop.f32.mrb[0].mxu1  ;;  %v1155_v21 = vpop.f32.mrb[0].mxu0 }
 0x1bf   : > { %v1339_v22 = vadd.f32 %v681_v20, %v289_v19  ;;  %v683_v23 = vpop.f32.mrb[1].mxu1  ;;  %v1157_v24 = vpop.f32.mrb[1].mxu0 }
 0x1c0   : > { %v1341_v25 = vadd.f32 %v683_v23, %v289_v19 }
 0x1c1   : > { %v1340_v26 = vadd.f32 %v1339_v22, %v1155_v21 }
 0x1c2   : > { %v1342_v27 = vadd.f32 %v1341_v25, %v1157_v24 }
 0x1c4   : > { %v1164_v28 = vcombine.low %v1340_v26, %v1342_v27 }
 0x1c6   : > { %v1166_v29 = vadd.f32 %v1164_v28, %v1769_v1 }
 0x1c8   : > { %1167 = vst [vmem:[%s278_s12] sm:$0xff] %v1166_v29 }
 0x1c9   : > { %1500 = shalt.err (!%p1497_p1)
}
 0x1ca   : > { %s1501_s14 = scalar_lea.hbm %s1880_s9, 128  ;;  %s1505_s17 = scalar_lea.hbm %s1929_s5, 256 }
 0x1cb   : > { %p1502_p11 = scmp.ne.s32.totalorder %s1880_s9, %s1501_s14  ;;  %p1506_p4 = scmp.lt.u32.totalorder %s1880_s9, %s1929_s5 }
 0x1cc   : > { %p1507_p10 = scmp.lt.u32.totalorder %s1505_s17, %s1501_s14  ;;  %p1509_p13 = scmp.lt.u32.totalorder %s1501_s14, %s1880_s9 }
 0x1cd   : > { %p1503_p12 = pnand %p1502_p11, %p1942_p3 }
 0x1ce   : > { %p1508_p6 = por %p1507_p10, %p1506_p4 }
 0x1cf   : > { %p1504_p2 = pneg %p1503_p12 }
 0x1d0   : > { %p1510_p7 = por %p1509_p13, %p1508_p6 }
 0x1d2   : > { %p1511_p5 = pnand %p1510_p7, %p1504_p2 }
 0x1d4   : > { %1514 = shalt.err (!%p1511_p5)
}
 0x1d5   : > { %1361 = dma.vmem_to_hbm [thread:$0]  (%p1942_p3), %s1882_s25, 128, %s1880_s9, %s1169_s28  }
 0x1d6 PF: > { %s1195_s29 = sand.u32 1, %s1545_s18   ;;  %p1943_p8 = scmp.ne.s32.totalorder %s1935_s6, 0 }
 0x1d7   : > { %p1944_p9 = scmp.ge.s32.totalorder %s1557_s21, 2  ;;  %s1196_s12 = scalar_lea.sflag [#allocation4], %s1195_s29 }
 0x1d9   : > { %p1371_p0 = pnand %p1944_p9, %p1943_p8 }
 0x1db   : > { %1540 = dma.done.wait (!%p1371_p0), %s1196_s12, 128  }
 0x1dc   : > { %1542 = vsyncadd (!%p1371_p0), %s1196_s12, 4294967168  ;;  %p21_p1 = scmp.ge.s32.totalorder %s1627_s24, 4   ;;  %s1945_s18 = smov %s1549_s19 }
 0x1dd   : > { %s1946_s19 = smov %s1553_s20  ;;  %s1947_s20 = smov %s1639_s27 }
 0x1de   : > { %s1948_s21 = smov %s1627_s24  ;;  %23 = sbr.rel (!%p21_p1) target bundleno = 7 (0x7), region = 113 }
 0x1e5   :  { %1201 = vsyncpa [#allocation3], 1 }
 0x1e6   :  { %1203 = vsyncpa [#allocation3 + $0x1], 1 }
 0x1e7   :  { %1204 = vsyncpa [#allocation6], 1 }
 0x1e8   :  { %1206 = vsyncpa [#allocation6 + $0x1], 1 }
 0x1e9   :  { %1207 = vsyncpa [#allocation4], 1 }
 0x1ea   :  { %1209 = vsyncpa [#allocation4 + $0x1], 1 }

</bundles_post_ra>
